<compile_context>
chip_gen: v5e
topology: v5e:2x2
jax: 0.10.0
libtpu: 0.0.40
codegen_flags: <defaults>
</compile_context>

<pallas_src>
import functools

import jax
import jax.numpy as jnp
from jax import lax
from jax.experimental import pallas as pl
from jax.experimental.pallas import tpu as pltpu

_LANES = 128
_SUBLANES = 8
_VREG_ELEMS = _SUBLANES * _LANES  # 1024 f32 elements per vreg row-group


def _fund_loss_kernel(pred_ref, truth_ref, out_ref, acc_ref, *,
                      rows, block_rows, per_core, may_be_ragged):
    c = pl.program_id(0)          # partition (TensorCore) index
    i = pl.program_id(1)          # block index within this partition

    @pl.when(i == 0)
    def _():
        acc_ref[...] = jnp.zeros_like(acc_ref)

    p = pred_ref[...].astype(jnp.float32)
    t = truth_ref[...].astype(jnp.float32)

    diff = jnp.abs(p - t)
    denom = jnp.abs(jnp.float32(1.5) - t)
    # mean(diff) + mean(diff/denom) == mean(diff * (1 + 1/denom)).
    # Exact reciprocal keeps torch semantics at truth == 1.5 (-> inf); the
    # kernel is DMA-bound so the extra VALU refinement is hidden.
    contrib = diff * (jnp.float32(1.0) + pl.reciprocal(denom, approx=False))

    def _accumulate(x):
        # Fold (block_rows, 128) down to one vreg with pure VPU adds
        # (leading-axis sum crosses vregs, not lanes -> no XLU).
        acc_ref[...] += x.reshape(block_rows // _SUBLANES, _SUBLANES,
                                  _LANES).sum(axis=0)

    if may_be_ragged:
        # Masking is needed only for the ragged last block and for clamped
        # over-range blocks (their index_map re-reads a valid block that must
        # not be counted).  Gate it so full blocks take the unmasked path.
        row0 = (c * per_core + i) * block_rows

        @pl.when(row0 + block_rows <= rows)
        def _():
            _accumulate(contrib)

        @pl.when(row0 + block_rows > rows)
        def _():
            sub = lax.broadcasted_iota(jnp.int32, contrib.shape, 0)
            mask = (row0 + sub) < rows
            _accumulate(jnp.where(mask, contrib, jnp.float32(0.0)))
    else:
        _accumulate(contrib)

    @pl.when(i == pl.num_programs(1) - 1)
    def _():
        # Lane-dense (8, 128) store; the cross-lane reduce happens in XLA.
        out_ref[0] = acc_ref[...]


def _elementwise_loss_terms(p, t):
    d = jnp.abs(p - t)
    return d + d / jnp.abs(jnp.float32(1.5) - t)


def _chip_kind():
    try:
        return jax.devices()[0].device_kind.lower()
    except Exception:  # pragma: no cover - defensive
        return ""


def fund_loss(pred, truth, *, block_rows=None):
    assert pred.shape == truth.shape, "pred and truth must have the same shape"
    n_valid = pred.size

    kind = _chip_kind()
    is_v7 = ("v7" in kind) or ("tpu7" in kind)
    if block_rows is None:
        # 2 MiB f32 blocks generally; 4 MiB on v7x (higher per-TC HBM BW, and
        # 2 inputs x 2 buffers x 4 MiB = 16 MiB still fits its 32 MiB scoped
        # VMEM default without any flag).
        block_rows = 8192 if is_v7 else 4096
    # Only v7x has 2 TensorCores per chip; on 1-TC chips the extra partition
    # axis is pure overhead (clamped re-reads, duplicated init/finalize).
    num_partitions = 2 if is_v7 else 1
    # TODO(synk): profile on v7x whether "parallel" actually shards the
    # leading axis across the two TensorCores; if not, switch that axis to
    # pltpu.CORE_PARALLEL.

    # Sublane-packing requirement for non-full blocks (f32:8, bf16:16, int8:32).
    def _row_multiple(dt):
        return _SUBLANES * max(1, 4 // jnp.dtype(dt).itemsize)
    row_mult = max(_row_multiple(pred.dtype), _row_multiple(truth.dtype))

    # Inputs keep their native dtype in HBM; the f32 cast happens in VMEM.
    pred_flat = jnp.ravel(pred)
    truth_flat = jnp.ravel(truth)

    # Kernel covers the largest prefix that is a multiple of 8*128 elements;
    # for typical NCHW sizes this is the whole array and there is no copy.
    n_main = (n_valid // _VREG_ELEMS) * _VREG_ELEMS
    rows = n_main // _LANES          # multiple of 8 by construction

    total = jnp.float32(0.0)

    # Tail (< 1024 elements): trivial plain-JAX epilogue.  Avoids a jnp.pad
    # read+write HBM copy of BOTH inputs for misaligned sizes.
    if n_main < n_valid:
        pt = pred_flat[n_main:].astype(jnp.float32)
        tt = truth_flat[n_main:].astype(jnp.float32)
        total = total + jnp.sum(_elementwise_loss_terms(pt, tt))

    if rows > 0:
        pred2d = pred_flat[:n_main].reshape(rows, _LANES)
        truth2d = truth_flat[:n_main].reshape(rows, _LANES)

        if rows >= block_rows:
            block_rows_eff = block_rows
            assert block_rows_eff % row_mult == 0, (
                f"block_rows={block_rows_eff} must be a multiple of {row_mult} "
                f"for dtypes {pred.dtype}/{truth.dtype}")
        else:
            # Block == full row extent is always a legal BlockSpec.
            block_rows_eff = rows

        nb = pl.cdiv(rows, block_rows_eff)
        if nb < num_partitions:
            num_partitions = 1
        per_core = pl.cdiv(nb, num_partitions)

        needs_clamp = (nb % num_partitions) != 0
        may_be_ragged = (rows % block_rows_eff != 0) or needs_clamp

        def in_index_map(c, i):
            idx = c * per_core + i
            if needs_clamp:
                # Over-range partition re-reads the last valid block; its
                # contribution is zeroed by the in-kernel mask.
                idx = jnp.minimum(idx, nb - 1)
            return (idx, 0)

        kernel = functools.partial(
            _fund_loss_kernel,
            rows=rows, block_rows=block_rows_eff, per_core=per_core,
            may_be_ragged=may_be_ragged)

        partials = pl.pallas_call(
            kernel,
            out_shape=jax.ShapeDtypeStruct(
                (num_partitions, _SUBLANES, _LANES), jnp.float32),
            grid_spec=pltpu.PrefetchScalarGridSpec(
                num_scalar_prefetch=0,
                grid=(num_partitions, per_core),
                in_specs=[
                    pl.BlockSpec((block_rows_eff, _LANES), in_index_map),
                    pl.BlockSpec((block_rows_eff, _LANES), in_index_map),
                ],
                out_specs=pl.BlockSpec((1, _SUBLANES, _LANES),
                                       lambda c, i: (c, 0, 0)),
                scratch_shapes=[pltpu.VMEM((_SUBLANES, _LANES), jnp.float32)],
            ),
            compiler_params=pltpu.CompilerParams(
                # Outer axis: independent per-core partial sums (only present
                # on v7x).  Inner axis: serial accumulation.
                dimension_semantics=("parallel", "arbitrary"),
            ),
        )(pred2d, truth2d)

        total = total + jnp.sum(partials)

    return total / n_valid


def fund_loss_ref(pred, truth):
    diff = jnp.abs(pred - truth)
    return jnp.mean(diff) + jnp.mean(diff / jnp.abs(jnp.float32(1.5) - truth))


if __name__ == "__main__":
    key = jax.random.PRNGKey(0)
    k1, k2, k3, k4, k5, k6, k7, k8 = jax.random.split(key, 8)

    # 1) Vreg-aligned NCHW tensor (2048 elems): single full block, no masking.
    shape = (2, 4, 16, 16)
    pred = jax.random.normal(k1, shape, dtype=jnp.float32)
    truth = jax.random.normal(k2, shape, dtype=jnp.float32)
    out = fund_loss(pred, truth)
    jax.block_until_ready(out)
    ref = fund_loss_ref(pred, truth)
    assert jnp.allclose(out, ref, rtol=1e-5, atol=1e-5), (out, ref)

    # 2) Ragged last block inside the kernel (rows=24, block_rows=16 -> the
    #    second block must mask 8 out-of-bounds garbage rows).
    shape2 = (2, 4, 16, 24)
    pred2 = jax.random.normal(k3, shape2, dtype=jnp.float32)
    truth2 = jax.random.normal(k4, shape2, dtype=jnp.float32)
    out2 = fund_loss(pred2, truth2, block_rows=16)
    jax.block_until_ready(out2)
    ref2 = fund_loss_ref(pred2, truth2)
    assert jnp.allclose(out2, ref2, rtol=1e-5, atol=1e-5), (out2, ref2)

    # 3) Size not a multiple of 1024 (1155 elems): kernel main part plus
    #    plain-JAX tail epilogue, no jnp.pad copy.
    shape3 = (3, 5, 7, 11)
    pred3 = jax.random.normal(k5, shape3, dtype=jnp.float32)
    truth3 = jax.random.normal(k6, shape3, dtype=jnp.float32)
    out3 = fund_loss(pred3, truth3)
    jax.block_until_ready(out3)
    ref3 = fund_loss_ref(pred3, truth3)
    assert jnp.allclose(out3, ref3, rtol=1e-5, atol=1e-5), (out3, ref3)

    # 4) Tiny input (< one vreg row-group): pure-JAX path, no kernel launch.
    shape4 = (2, 3, 5)
    pred4 = jax.random.normal(k7, shape4, dtype=jnp.float32)
    truth4 = jax.random.normal(k8, shape4, dtype=jnp.float32)
    out4 = fund_loss(pred4, truth4)
    jax.block_until_ready(out4)
    ref4 = fund_loss_ref(pred4, truth4)
    assert jnp.allclose(out4, ref4, rtol=1e-5, atol=1e-5), (out4, ref4)

    print("KERNEL_OK")
</pallas_src>

<mosaic_0001>
module attributes {stable_mosaic.version = 11 : i64} {
  func.func @_fund_loss_kernel(%arg0: i32, %arg1: i32, %arg2: memref<16x128xf32, #tpu.memory_space<vmem>>, %arg3: memref<16x128xf32, #tpu.memory_space<vmem>>, %arg4: memref<1x8x128xf32, #tpu.memory_space<vmem>>, %arg5: memref<8x128xf32, #tpu.memory_space<vmem>>) attributes {dimension_semantics = [#tpu.dimension_semantics<parallel>, #tpu.dimension_semantics<arbitrary>], iteration_bounds = array<i64: 1, 1>, scalar_prefetch = 0 : i64, scratch_operands = 1 : i64, tpu.core_type = #tpu.core_type<tc>, window_params = [{transform_indices = @transform_0, window_bounds = array<i64: 16, 128>}, {transform_indices = @transform_1, window_bounds = array<i64: 16, 128>}, {transform_indices = @transform_2, window_bounds = array<i64: 1, 8, 128>}]} {
    %c0_i32 = arith.constant 0 : i32
    %0 = arith.cmpi eq, %arg1, %c0_i32 : i32
    %1 = arith.extui %0 : i1 to i32
    %c0_i32_0 = arith.constant 0 : i32
    %2 = arith.cmpi ne, %1, %c0_i32_0 : i32
    scf.if %2 {
      %cst_12 = arith.constant 0.000000e+00 : f32
      %22 = vector.broadcast %cst_12 : f32 to vector<8x128xf32>
      %c0_13 = arith.constant 0 : index
      %c0_14 = arith.constant 0 : index
      %23 = vector.load %arg5[%c0_13, %c0_14] : memref<8x128xf32, #tpu.memory_space<vmem>>, vector<8x128xf32>
      tpu.vector_store %arg5[%c0_13, %c0_14], %22 {strides = array<i32>} : memref<8x128xf32, #tpu.memory_space<vmem>>, vector<8x128xf32>,
    } else {
    }
    %c0 = arith.constant 0 : index
    %c0_1 = arith.constant 0 : index
    %3 = vector.load %arg2[%c0, %c0_1] : memref<16x128xf32, #tpu.memory_space<vmem>>, vector<16x128xf32>
    %c0_2 = arith.constant 0 : index
    %c0_3 = arith.constant 0 : index
    %4 = vector.load %arg3[%c0_2, %c0_3] : memref<16x128xf32, #tpu.memory_space<vmem>>, vector<16x128xf32>
    %5 = arith.subf %3, %4 : vector<16x128xf32>
    %6 = math.absf %5 : vector<16x128xf32>
    %cst = arith.constant 1.500000e+00 : f32
    %7 = vector.broadcast %cst : f32 to vector<16x128xf32>
    %8 = arith.subf %7, %4 : vector<16x128xf32>
    %9 = math.absf %8 : vector<16x128xf32>
    %10 = tpu.reciprocal %9 : vector<16x128xf32> -> vector<16x128xf32>
    %cst_4 = arith.constant 1.000000e+00 : f32
    %11 = vector.broadcast %cst_4 : f32 to vector<16x128xf32>
    %12 = arith.addf %11, %10 : vector<16x128xf32>
    %13 = arith.mulf %6, %12 : vector<16x128xf32>
    %c0_5 = arith.constant 0 : index
    %c0_6 = arith.constant 0 : index
    %14 = vector.load %arg5[%c0_5, %c0_6] : memref<8x128xf32, #tpu.memory_space<vmem>>, vector<8x128xf32>
    %15 = vector.shape_cast %13 : vector<16x128xf32> to vector<2x8x128xf32>
    %cst_7 = arith.constant dense<0.000000e+00> : vector<8x128xf32>
    %16 = vector.multi_reduction <add>, %15, %cst_7 [0] : vector<2x8x128xf32> to vector<8x128xf32>
    %17 = arith.addf %14, %16 : vector<8x128xf32>
    %c0_8 = arith.constant 0 : index
    %c0_9 = arith.constant 0 : index
    %18 = vector.load %arg5[%c0_8, %c0_9] : memref<8x128xf32, #tpu.memory_space<vmem>>, vector<8x128xf32>
    tpu.vector_store %arg5[%c0_8, %c0_9], %17 {strides = array<i32>} : memref<8x128xf32, #tpu.memory_space<vmem>>, vector<8x128xf32>,
    %c0_i32_10 = arith.constant 0 : i32
    %19 = arith.cmpi eq, %arg1, %c0_i32_10 : i32
    %20 = arith.extui %19 : i1 to i32
    %c0_i32_11 = arith.constant 0 : i32
    %21 = arith.cmpi ne, %20, %c0_i32_11 : i32
    scf.if %21 {
      %c0_12 = arith.constant 0 : index
      %c0_13 = arith.constant 0 : index
      %22 = vector.load %arg5[%c0_12, %c0_13] : memref<8x128xf32, #tpu.memory_space<vmem>>, vector<8x128xf32>
      %c0_14 = arith.constant 0 : index
      %c0_15 = arith.constant 0 : index
      %c0_16 = arith.constant 0 : index
      %23 = vector.load %arg4[%c0_14, %c0_15, %c0_16] : memref<1x8x128xf32, #tpu.memory_space<vmem>>, vector<1x8x128xf32>
      %24 = vector.shape_cast %23 : vector<1x8x128xf32> to vector<8x128xf32>
      %25 = vector.shape_cast %22 : vector<8x128xf32> to vector<1x8x128xf32>
      tpu.vector_store %arg4[%c0_14, %c0_15, %c0_16], %25 {strides = array<i32>} : memref<1x8x128xf32, #tpu.memory_space<vmem>>, vector<1x8x128xf32>,
    } else {
    }
    return
  }
  func.func @transform_0(%arg0: i32, %arg1: i32) -> (i32, i32) {
    %c1_i32 = arith.constant 1 : i32
    %0 = arith.muli %arg0, %c1_i32 : i32
    %1 = arith.addi %0, %arg1 : i32
    %c0_i32 = arith.constant 0 : i32
    %c0_i32_0 = arith.constant 0 : i32
    return %1, %c0_i32 : i32, i32
  }
  func.func @transform_1(%arg0: i32, %arg1: i32) -> (i32, i32) {
    %c1_i32 = arith.constant 1 : i32
    %0 = arith.muli %arg0, %c1_i32 : i32
    %1 = arith.addi %0, %arg1 : i32
    %c0_i32 = arith.constant 0 : i32
    %c0_i32_0 = arith.constant 0 : i32
    return %1, %c0_i32 : i32, i32
  }
  func.func @transform_2(%arg0: i32, %arg1: i32) -> (i32, i32, i32) {
    %c0_i32 = arith.constant 0 : i32
    %c0_i32_0 = arith.constant 0 : i32
    %c0_i32_1 = arith.constant 0 : i32
    return %arg0, %c0_i32, %c0_i32_0 : i32, i32, i32
  }
}

</mosaic_0001>

<bundles_post_ra>
// kernel: tpu_custom_call.1
= control target key start
LH: loop header
LB: loop body
LE: loop exit
PB: predicated region body
PF: predicated region fallthrough
CT: control target
= control target key end

     0   :  { %7 = vsyncpa [#allocation4], 0  ;;  %s248_s0 = inlined_call_operand.hbm [shape: f32[16,128], index: 0, kind: input, shape index: {}]   ;;  %s249_s1 = inlined_call_operand.hbm [shape: f32[16,128], index: 1, kind: input, shape index: {}]   ;;  %s250_s2 = inlined_call_operand.hbm [shape: f32[1,8,128], index: 2, kind: output, shape index: {}]  }
   0x1   :  { %8 = vsyncpa [#allocation7], 0 }
   0x2   :  { %9 = vsyncpa [#allocation5], 0  ;;  %s18_s11 = sshll.u32 %s248_s0, 4  ;;  %s219_s12 = smov [#allocation3]   ;;  %s19_s11 = int_to_ptr.hbm [resolvable:$true] %s18_s11 }
   0x3   :  { %s20_s13 = sshll.u32 %s219_s12, 4  ;;  %s35_s16 = sshll.u32 %s249_s1, 4  ;;  %s21_s13 = int_to_ptr.vmem [resolvable:$true] %s20_s13  ;;  %s36_s16 = int_to_ptr.hbm [resolvable:$true] %s35_s16 }
   0x4   :  { %s220_s17 = smov 128   ;;  %s221_s18 = smov 8  }
   0x5   :  { %26 = dma.hbm_to_vmem [thread:$0]  %s19_s11, 256, %s21_s13, [#allocation4], %s220_s17, %s220_s17, %s221_s18  }
   0x6   :  { %s222_s19 = smov [#allocation6]  }
   0x7   :  { %s37_s20 = sshll.u32 %s222_s19, 4  ;;  %s38_s20 = int_to_ptr.vmem [resolvable:$true] %s37_s20 }
   0x8   :  { %43 = dma.hbm_to_vmem [thread:$0]  %s36_s16, 256, %s38_s20, [#allocation7], %s220_s17, %s220_s17, %s221_s18  }
   0x9   :  { %213 = dma.done.wait [#allocation4], 256  }
   0xa   :  { %214 = vsyncadd [#allocation4], 4294967040 }
   0xb   :  { %215 = dma.done.wait [#allocation7], 256  }
   0xc   :  { %216 = vsyncadd [#allocation7], 4294967040  ;;  %v63_v0 = vld [vmem:[#allocation6] sm:$0xff]  ;;  %v64_v1 = vld [vmem:[#allocation6 + $0x8] sm:$0xff]  ;;  %s223_s0 = smov [#allocation8]   ;;  %s121_s23 = sshll.u32 %s250_s2, 4  ;;  %s122_s23 = int_to_ptr.hbm [resolvable:$true] %s121_s23 }
   0xd   :  { %v69_v2 = vsub.f32 1.5, %v63_v0  ;;  %v70_v3 = vsub.f32 1.5, %v64_v1  ;;  %v61_v9 = vld [vmem:[#allocation3] sm:$0xff]  ;;  %v62_v12 = vld [vmem:[#allocation3 + $0x8] sm:$0xff]  ;;  %s119_s1 = sshll.u32 %s223_s0, 4  ;;  %s120_s1 = int_to_ptr.vmem [resolvable:$true] %s119_s1 }
   0xe   :  { %v65_v16 = vsub.f32 %v61_v9, %v63_v0  ;;  %v66_v18 = vsub.f32 %v62_v12, %v64_v1 }
   0xf   :  { %v71_v4 = vand.u32 2147483647, %v69_v2  ;;  %v72_v5 = vand.u32 2147483647, %v70_v3 }
  0x10   :  { %v67_v24 = vand.u32 2147483647, %v65_v16  ;;  %v68_v26 = vand.u32 2147483647, %v66_v18 }
  0x11   :  { %137 = vrcp.f32 %v71_v4  ;;  %v84_v10 = vand.u32 2147483648, %v71_v4  ;;  %vm78_vm0 = vweird.f32 %v71_v4  ;;  %v98_v14 = vand.u32 2147483648, %v72_v5 }
  0x12   :  { %139 = vrcp.f32 %v72_v5  ;;  %vm92_vm2 = vweird.f32 %v72_v5  ;;  %vm83_vm5 = vcmp.eq.f32.partialorder %v71_v4, 8.507059e+37  ;;  %vm97_vm7 = vcmp.eq.f32.partialorder %v72_v5, 8.507059e+37 }
  0x13   :  { %v85_v19 = vor.u32 1.1754944e-38, %v84_v10  ;;  %v99_v22 = vor.u32 1.1754944e-38, %v98_v14 }
  0x17   :  { %v138_v6 = vpop.eup %137 }
  0x18   :  { %v140_v7 = vpop.eup %139  ;;  %v74_v8 = vmul.f32 %v138_v6, %v71_v4  ;;  %vm79_vm1 = vweird.f32 %v138_v6 }
  0x19   :  { %v88_v11 = vmul.f32 %v140_v7, %v72_v5  ;;  %vm93_vm3 = vweird.f32 %v140_v7  ;;  %vm80_vm4 = vmor %vm78_vm0, %vm79_vm1 }
  0x1a   :  { %v75_v13 = vsub.f32 1.0, %v74_v8  ;;  %vm94_vm6 = vmor %vm92_vm2, %vm93_vm3 }
  0x1b   :  { %v89_v15 = vsub.f32 1.0, %v88_v11 }
  0x1c   :  { %v76_v17 = vmul.f32 %v138_v6, %v75_v13 }
  0x1d   :  { %v90_v20 = vmul.f32 %v140_v7, %v89_v15 }
  0x1e   :  { %v77_v21 = vadd.f32 %v138_v6, %v76_v17 }
  0x1f   :  { %v91_v23 = vadd.f32 %v140_v7, %v90_v20 }
  0x20   :  { %v81_v25 = vsel %vm80_vm4, %v138_v6, %v77_v21 }
  0x21   :  { %v86_v27 = vsel %vm83_vm5, %v85_v19, %v81_v25  ;;  %v95_v28 = vsel %vm94_vm6, %v140_v7, %v91_v23 }
  0x22   :  { %v100_v29 = vsel %vm97_vm7, %v99_v22, %v95_v28  ;;  %v101_v30 = vadd.f32 1.0, %v86_v27 }
  0x23   :  { %v102_v31 = vadd.f32 1.0, %v100_v29 }
  0x24   :  { %v103_v32 = vmul.f32 %v101_v30, %v67_v24 }
  0x25   :  { %v104_v33 = vmul.f32 %v102_v31, %v68_v26 }
  0x27   :  { %v106_v34 = vadd.f32 %v104_v33, %v103_v32 }
  0x29   :  { %113 = vst [vmem:[#allocation8] sm:$0xff] %v106_v34 }
  0x2a   :  { %124 = dma.vmem_to_hbm [thread:$0]  %s120_s1, 128, %s122_s23, [#allocation5]  }
  0x2b   :  { %217 = dma.done.wait [#allocation5], 128  }
  0x2c   :  { %218 = vsyncadd [#allocation5], 4294967168 }
  0x2d   :  { %129 = vsyncpa [#allocation4], 1 }
  0x2e   :  { %130 = vsyncpa [#allocation7], 1 }
  0x2f   :  { %131 = vsyncpa [#allocation5], 1 }

</bundles_post_ra>
